<compile_context>
chip_gen: v5e
topology: v5e:2x2
jax: 0.10.0
libtpu: 0.0.40
codegen_flags: <defaults>
</compile_context>

<pallas_src>
import jax
import jax.numpy as jnp
from jax.experimental import pallas as pl
from jax.experimental.pallas import tpu as pltpu


# ---------------------------------------------------------------------------
# Parameter preparation (runs once, outside the kernel)
# ---------------------------------------------------------------------------

def _banded_weight(w, width):
    """(3,3,Cin,Cout) conv kernel -> (3, width*Cin, width*Cout) banded matmul weights.

    mats[dh, wi*Cin+ci, wo*Cout+co] = w[dh, wi-wo+1, ci, co] if wi-wo+1 in {0,1,2} else 0,
    so a lane-dense row a[wi*Cin+ci] = x[wi,ci] gives
      (a @ mats[dh])[wo*Cout+co] = sum_{dw,ci} x[wo+dw-1, ci] * w[dh, dw, ci, co]
    with the W-direction zero padding implicit in the band.
    """
    Cin, Cout = w.shape[2], w.shape[3]
    wi = jnp.arange(width)[:, None]          # input width position
    wo = jnp.arange(width)[None, :]          # output width position
    tap = wi - wo + 1                        # horizontal tap index
    valid = (tap >= 0) & (tap <= 2)
    tap_c = jnp.clip(tap, 0, 2)
    mats = []
    for dh in range(3):
        g = w[dh][tap_c]                                        # (width, width, Cin, Cout)
        g = jnp.where(valid[:, :, None, None], g, 0.0)
        mats.append(jnp.transpose(g, (0, 2, 1, 3)).reshape(width * Cin, width * Cout))
    return jnp.stack(mats, axis=0).astype(jnp.float32)


def _lane_bias(b, width):
    """(1, Cout) bias -> (1, 1, width*Cout) lane-dense bias (b[co] at lane w*Cout+co)."""
    Cout = b.shape[-1]
    return jnp.tile(b.reshape(1, Cout), (1, width)).reshape(1, 1, width * Cout).astype(jnp.float32)


def prepare_fused_params(params, width, sublayer_nb=1):
    """Pack the truncated backbone's weights into the fused-kernel form.

    Truncation (layer_nb=2 on the synthetic net): keep conv0(+relu) and stage blocks
    [0 .. sublayer_nb].
    """
    mats = [_banded_weight(params["conv0_w"], width)]
    biases = [_lane_bias(params["conv0_b"], width)]
    for i in range(sublayer_nb + 1):
        mats.append(_banded_weight(params["stage_w"][i], width))
        biases.append(_lane_bias(params["stage_b"][i], width))
    return mats, biases


# ---------------------------------------------------------------------------
# Fused Pallas kernel
# ---------------------------------------------------------------------------

def _make_fused_kernel(n_convs, H):
    """Build a kernel computing n_convs fused [conv3x3(pad=1) + bias + ReLU] layers.

    Ref order: x, mats_0..mats_{n-1}, bias_0..bias_{n-1}, out, pad_in, pad_mid
      x      : (N, H, W*Cin)      lane-dense input
      mats_i : (3, K_i, W*Cout)   banded weights (3 vertical taps)
      bias_i : (1, 1, W*Cout)     lane-dense bias
      out    : (N, H, W*Cout)     lane-dense output (last dim = 128 here)
      pad_in : (N, H+2, W*Cin)    VMEM scratch, H-padded layer-0 input
      pad_mid: (N, H+2, W*Cout)   VMEM scratch, H-padded intermediates (reused)
    """
    def kernel(*refs):
        x_ref = refs[0]
        m_refs = refs[1:1 + n_convs]
        b_refs = refs[1 + n_convs:1 + 2 * n_convs]
        o_ref = refs[1 + 2 * n_convs]
        pad_in = refs[2 + 2 * n_convs]
        pad_mid = refs[3 + 2 * n_convs]

        def conv_relu(src_pad, m_ref, b_ref):
            acc = None
            for dh in range(3):                       # 3 vertical taps -> 3 MXU matmuls
                a = src_pad[:, dh:dh + H, :]          # (N, H, K) lane-dense slab
                part = jax.lax.dot_general(
                    a, m_ref[dh],
                    dimension_numbers=(((2,), (0,)), ((), ())),
                    preferred_element_type=jnp.float32)
                acc = part if acc is None else acc + part
            return jnp.maximum(acc + b_ref[...], 0.0)  # bias broadcast + ReLU

        # Layer 0: in-kernel halo (H) padding of the external input.
        pad_in[...] = jnp.zeros_like(pad_in)
        pad_in[:, 1:H + 1, :] = x_ref[...]
        y = conv_relu(pad_in, m_refs[0], b_refs[0])

        # Remaining layers: intermediates never leave VMEM; one padded buffer reused
        # (halo rows stay zero because only the interior is ever rewritten).
        if n_convs > 1:
            pad_mid[...] = jnp.zeros_like(pad_mid)
            for i in range(1, n_convs):
                pad_mid[:, 1:H + 1, :] = y
                y = conv_relu(pad_mid, m_refs[i], b_refs[i])

        o_ref[...] = y.astype(o_ref.dtype)

    return kernel


def feat_extract_mid_forward(x_nchw, mats, biases):
    """Fused forward of the truncated backbone: one pallas_call, no grid.

    x_nchw: (N, Cin, H, W) float32 (PyTorch layout).  Returns (N, Cmid, H, W).
    """
    N, Cin, H, W = x_nchw.shape
    n_convs = len(mats)
    wc_out = mats[-1].shape[-1]                        # W * Cmid (= 128 here)

    # layout: NCHW -> lane-dense (N, H, W*Cin); channel is minor within each lane group.
    x = jnp.transpose(x_nchw, (0, 2, 3, 1)).reshape(N, H, W * Cin)

    vmem = pl.BlockSpec(memory_space=pltpu.MemorySpace.VMEM)   # whole array resident in VMEM
    out_flat = pl.pallas_call(
        _make_fused_kernel(n_convs, H),
        out_shape=jax.ShapeDtypeStruct((N, H, wc_out), jnp.float32),
        in_specs=[vmem] * (1 + 2 * n_convs),
        out_specs=vmem,
        scratch_shapes=[
            pltpu.VMEM((N, H + 2, W * Cin), jnp.float32),   # H-padded layer-0 input
            pltpu.VMEM((N, H + 2, wc_out), jnp.float32),    # H-padded mid activations
        ],
    )(x, *mats, *biases)

    Cmid = wc_out // W
    out = out_flat.reshape(N, H, W, Cmid)
    return jnp.transpose(out, (0, 3, 1, 2))            # back to NCHW


# ---------------------------------------------------------------------------
# Synthetic backbone parameters + pure-JAX reference (for verification)
# ---------------------------------------------------------------------------

def init_params(key, cin=4, cmid=8, n_stage_blocks=3):
    """Deterministic synthetic backbone parameters (weights as (3,3,Cin,Cout), bias (1,Cout))."""
    keys = jax.random.split(key, 2 * (1 + n_stage_blocks))
    params = {
        "conv0_w": 0.1 * jax.random.normal(keys[0], (3, 3, cin, cmid), jnp.float32),
        "conv0_b": 0.1 * jax.random.normal(keys[1], (1, cmid), jnp.float32),
        "stage_w": [],
        "stage_b": [],
    }
    for i in range(n_stage_blocks):
        params["stage_w"].append(
            0.1 * jax.random.normal(keys[2 + 2 * i], (3, 3, cmid, cmid), jnp.float32))
        params["stage_b"].append(
            0.1 * jax.random.normal(keys[3 + 2 * i], (1, cmid), jnp.float32))
    return params


def _reference_forward(x_nchw, params, sublayer_nb=1):
    """Pure-JAX (non-Pallas) reference of the truncated forward."""
    def conv_relu(x, w, b):
        N, H, W, Cin = x.shape
        Cout = w.shape[-1]
        xp = jnp.pad(x, ((0, 0), (1, 1), (1, 1), (0, 0)))
        acc = jnp.zeros((N, H, W, Cout), jnp.float32)
        for dh in range(3):
            for dw in range(3):
                acc = acc + jnp.einsum(
                    "nhwc,cd->nhwd", xp[:, dh:dh + H, dw:dw + W, :], w[dh, dw],
                    precision=jax.lax.Precision.HIGHEST)
        return jnp.maximum(acc + b.reshape(1, 1, 1, Cout), 0.0)

    y = jnp.transpose(x_nchw, (0, 2, 3, 1))
    y = conv_relu(y, params["conv0_w"], params["conv0_b"])
    for i in range(sublayer_nb + 1):
        y = conv_relu(y, params["stage_w"][i], params["stage_b"][i])
    return jnp.transpose(y, (0, 3, 1, 2))


if __name__ == "__main__":
    key = jax.random.PRNGKey(0)
    k_in, k_par = jax.random.split(key)

    N, Cin, H, W = 2, 4, 16, 16
    x = jax.random.normal(k_in, (N, Cin, H, W), jnp.float32)      # NCHW like PyTorch

    params = init_params(k_par, cin=Cin, cmid=8, n_stage_blocks=3)
    # Truncation layer_nb=2, sublayer_nb=1 -> conv0+relu followed by stage blocks 0..1.
    mats, biases = prepare_fused_params(params, width=W, sublayer_nb=1)

    fwd = jax.jit(feat_extract_mid_forward)
    out = jax.block_until_ready(fwd(x, mats, biases))

    assert out.shape == (N, 8, H, W), out.shape
    assert bool(jnp.all(jnp.isfinite(out)))

    ref = _reference_forward(x, params, sublayer_nb=1)
    max_err = float(jnp.max(jnp.abs(out - ref)))
    assert bool(jnp.allclose(out, ref, atol=1e-3, rtol=1e-3)), max_err

    print("KERNEL_OK")
</pallas_src>

<mosaic_0001>
module attributes {stable_mosaic.version = 11 : i64} {
  func.func @kernel(%arg0: memref<2x16x64xf32, #tpu.memory_space<vmem>>, %arg1: memref<3x64x128xf32, #tpu.memory_space<vmem>>, %arg2: memref<3x128x128xf32, #tpu.memory_space<vmem>>, %arg3: memref<3x128x128xf32, #tpu.memory_space<vmem>>, %arg4: memref<1x1x128xf32, #tpu.memory_space<vmem>>, %arg5: memref<1x1x128xf32, #tpu.memory_space<vmem>>, %arg6: memref<1x1x128xf32, #tpu.memory_space<vmem>>, %arg7: memref<2x16x128xf32, #tpu.memory_space<vmem>>, %arg8: memref<2x18x64xf32, #tpu.memory_space<vmem>>, %arg9: memref<2x18x128xf32, #tpu.memory_space<vmem>>) attributes {dimension_semantics = [], scalar_prefetch = 0 : i64, scratch_operands = 2 : i64, tpu.core_type = #tpu.core_type<tc>} {
    %cst = arith.constant 0.000000e+00 : f32
    %0 = vector.broadcast %cst : f32 to vector<2x18x64xf32>
    %c0 = arith.constant 0 : index
    %c0_0 = arith.constant 0 : index
    %c0_1 = arith.constant 0 : index
    %1 = vector.load %arg8[%c0, %c0_0, %c0_1] : memref<2x18x64xf32, #tpu.memory_space<vmem>>, vector<2x18x64xf32>
    tpu.vector_store %arg8[%c0, %c0_0, %c0_1], %0 {strides = array<i32>} : memref<2x18x64xf32, #tpu.memory_space<vmem>>, vector<2x18x64xf32>,
    %c0_2 = arith.constant 0 : index
    %c0_3 = arith.constant 0 : index
    %c0_4 = arith.constant 0 : index
    %2 = vector.load %arg0[%c0_2, %c0_3, %c0_4] : memref<2x16x64xf32, #tpu.memory_space<vmem>>, vector<2x16x64xf32>
    %c0_5 = arith.constant 0 : index
    %c1 = arith.constant 1 : index
    %c0_6 = arith.constant 0 : index
    %3 = vector.load %arg8[%c0_5, %c1, %c0_6] : memref<2x18x64xf32, #tpu.memory_space<vmem>>, vector<2x16x64xf32>
    tpu.vector_store %arg8[%c0_5, %c1, %c0_6], %2 {strides = array<i32>} : memref<2x18x64xf32, #tpu.memory_space<vmem>>, vector<2x16x64xf32>,
    %c0_7 = arith.constant 0 : index
    %c0_8 = arith.constant 0 : index
    %c0_9 = arith.constant 0 : index
    %4 = vector.load %arg8[%c0_7, %c0_8, %c0_9] : memref<2x18x64xf32, #tpu.memory_space<vmem>>, vector<2x16x64xf32>
    %c0_10 = arith.constant 0 : index
    %c0_11 = arith.constant 0 : index
    %c0_12 = arith.constant 0 : index
    %5 = vector.load %arg1[%c0_10, %c0_11, %c0_12] : memref<3x64x128xf32, #tpu.memory_space<vmem>>, vector<1x64x128xf32>
    %6 = vector.shape_cast %5 : vector<1x64x128xf32> to vector<64x128xf32>
    %cst_13 = arith.constant dense<0.000000e+00> : vector<2x16x128xf32>
    %7 = tpu.matmul %4, %6, %cst_13 {dimension_numbers = #tpu.dot_dimension_numbers<[2], [0], [0, 1], [1], [0, 0, 0, 1, 1, 1], [], []>} : vector<2x16x64xf32>, vector<64x128xf32>, vector<2x16x128xf32> -> vector<2x16x128xf32>
    %c0_14 = arith.constant 0 : index
    %c1_15 = arith.constant 1 : index
    %c0_16 = arith.constant 0 : index
    %8 = vector.load %arg8[%c0_14, %c1_15, %c0_16] : memref<2x18x64xf32, #tpu.memory_space<vmem>>, vector<2x16x64xf32>
    %c1_17 = arith.constant 1 : index
    %c0_18 = arith.constant 0 : index
    %c0_19 = arith.constant 0 : index
    %9 = vector.load %arg1[%c1_17, %c0_18, %c0_19] : memref<3x64x128xf32, #tpu.memory_space<vmem>>, vector<1x64x128xf32>
    %10 = vector.shape_cast %9 : vector<1x64x128xf32> to vector<64x128xf32>
    %cst_20 = arith.constant dense<0.000000e+00> : vector<2x16x128xf32>
    %11 = tpu.matmul %8, %10, %cst_20 {dimension_numbers = #tpu.dot_dimension_numbers<[2], [0], [0, 1], [1], [0, 0, 0, 1, 1, 1], [], []>} : vector<2x16x64xf32>, vector<64x128xf32>, vector<2x16x128xf32> -> vector<2x16x128xf32>
    %12 = arith.addf %7, %11 : vector<2x16x128xf32>
    %c0_21 = arith.constant 0 : index
    %c2 = arith.constant 2 : index
    %c0_22 = arith.constant 0 : index
    %13 = vector.load %arg8[%c0_21, %c2, %c0_22] : memref<2x18x64xf32, #tpu.memory_space<vmem>>, vector<2x16x64xf32>
    %c2_23 = arith.constant 2 : index
    %c0_24 = arith.constant 0 : index
    %c0_25 = arith.constant 0 : index
    %14 = vector.load %arg1[%c2_23, %c0_24, %c0_25] : memref<3x64x128xf32, #tpu.memory_space<vmem>>, vector<1x64x128xf32>
    %15 = vector.shape_cast %14 : vector<1x64x128xf32> to vector<64x128xf32>
    %cst_26 = arith.constant dense<0.000000e+00> : vector<2x16x128xf32>
    %16 = tpu.matmul %13, %15, %cst_26 {dimension_numbers = #tpu.dot_dimension_numbers<[2], [0], [0, 1], [1], [0, 0, 0, 1, 1, 1], [], []>} : vector<2x16x64xf32>, vector<64x128xf32>, vector<2x16x128xf32> -> vector<2x16x128xf32>
    %17 = arith.addf %12, %16 : vector<2x16x128xf32>
    %c0_27 = arith.constant 0 : index
    %c0_28 = arith.constant 0 : index
    %c0_29 = arith.constant 0 : index
    %18 = vector.load %arg4[%c0_27, %c0_28, %c0_29] : memref<1x1x128xf32, #tpu.memory_space<vmem>>, vector<1x1x128xf32>
    %19 = vector.broadcast %18 : vector<1x1x128xf32> to vector<2x16x128xf32>
    %20 = arith.addf %17, %19 : vector<2x16x128xf32>
    %cst_30 = arith.constant 0.000000e+00 : f32
    %21 = vector.broadcast %cst_30 : f32 to vector<2x16x128xf32>
    %22 = arith.maximumf %20, %21 : vector<2x16x128xf32>
    %cst_31 = arith.constant 0.000000e+00 : f32
    %23 = vector.broadcast %cst_31 : f32 to vector<2x18x128xf32>
    %c0_32 = arith.constant 0 : index
    %c0_33 = arith.constant 0 : index
    %c0_34 = arith.constant 0 : index
    %24 = vector.load %arg9[%c0_32, %c0_33, %c0_34] : memref<2x18x128xf32, #tpu.memory_space<vmem>>, vector<2x18x128xf32>
    tpu.vector_store %arg9[%c0_32, %c0_33, %c0_34], %23 {strides = array<i32>} : memref<2x18x128xf32, #tpu.memory_space<vmem>>, vector<2x18x128xf32>,
    %c0_35 = arith.constant 0 : index
    %c1_36 = arith.constant 1 : index
    %c0_37 = arith.constant 0 : index
    %25 = vector.load %arg9[%c0_35, %c1_36, %c0_37] : memref<2x18x128xf32, #tpu.memory_space<vmem>>, vector<2x16x128xf32>
    tpu.vector_store %arg9[%c0_35, %c1_36, %c0_37], %22 {strides = array<i32>} : memref<2x18x128xf32, #tpu.memory_space<vmem>>, vector<2x16x128xf32>,
    %c0_38 = arith.constant 0 : index
    %c0_39 = arith.constant 0 : index
    %c0_40 = arith.constant 0 : index
    %26 = vector.load %arg9[%c0_38, %c0_39, %c0_40] : memref<2x18x128xf32, #tpu.memory_space<vmem>>, vector<2x16x128xf32>
    %c0_41 = arith.constant 0 : index
    %c0_42 = arith.constant 0 : index
    %c0_43 = arith.constant 0 : index
    %27 = vector.load %arg2[%c0_41, %c0_42, %c0_43] : memref<3x128x128xf32, #tpu.memory_space<vmem>>, vector<1x128x128xf32>
    %28 = vector.shape_cast %27 : vector<1x128x128xf32> to vector<128x128xf32>
    %cst_44 = arith.constant dense<0.000000e+00> : vector<2x16x128xf32>
    %29 = tpu.matmul %26, %28, %cst_44 {dimension_numbers = #tpu.dot_dimension_numbers<[2], [0], [0, 1], [1], [0, 0, 0, 1, 1, 1], [], []>} : vector<2x16x128xf32>, vector<128x128xf32>, vector<2x16x128xf32> -> vector<2x16x128xf32>
    %c0_45 = arith.constant 0 : index
    %c1_46 = arith.constant 1 : index
    %c0_47 = arith.constant 0 : index
    %30 = vector.load %arg9[%c0_45, %c1_46, %c0_47] : memref<2x18x128xf32, #tpu.memory_space<vmem>>, vector<2x16x128xf32>
    %c1_48 = arith.constant 1 : index
    %c0_49 = arith.constant 0 : index
    %c0_50 = arith.constant 0 : index
    %31 = vector.load %arg2[%c1_48, %c0_49, %c0_50] : memref<3x128x128xf32, #tpu.memory_space<vmem>>, vector<1x128x128xf32>
    %32 = vector.shape_cast %31 : vector<1x128x128xf32> to vector<128x128xf32>
    %cst_51 = arith.constant dense<0.000000e+00> : vector<2x16x128xf32>
    %33 = tpu.matmul %30, %32, %cst_51 {dimension_numbers = #tpu.dot_dimension_numbers<[2], [0], [0, 1], [1], [0, 0, 0, 1, 1, 1], [], []>} : vector<2x16x128xf32>, vector<128x128xf32>, vector<2x16x128xf32> -> vector<2x16x128xf32>
    %34 = arith.addf %29, %33 : vector<2x16x128xf32>
    %c0_52 = arith.constant 0 : index
    %c2_53 = arith.constant 2 : index
    %c0_54 = arith.constant 0 : index
    %35 = vector.load %arg9[%c0_52, %c2_53, %c0_54] : memref<2x18x128xf32, #tpu.memory_space<vmem>>, vector<2x16x128xf32>
    %c2_55 = arith.constant 2 : index
    %c0_56 = arith.constant 0 : index
    %c0_57 = arith.constant 0 : index
    %36 = vector.load %arg2[%c2_55, %c0_56, %c0_57] : memref<3x128x128xf32, #tpu.memory_space<vmem>>, vector<1x128x128xf32>
    %37 = vector.shape_cast %36 : vector<1x128x128xf32> to vector<128x128xf32>
    %cst_58 = arith.constant dense<0.000000e+00> : vector<2x16x128xf32>
    %38 = tpu.matmul %35, %37, %cst_58 {dimension_numbers = #tpu.dot_dimension_numbers<[2], [0], [0, 1], [1], [0, 0, 0, 1, 1, 1], [], []>} : vector<2x16x128xf32>, vector<128x128xf32>, vector<2x16x128xf32> -> vector<2x16x128xf32>
    %39 = arith.addf %34, %38 : vector<2x16x128xf32>
    %c0_59 = arith.constant 0 : index
    %c0_60 = arith.constant 0 : index
    %c0_61 = arith.constant 0 : index
    %40 = vector.load %arg5[%c0_59, %c0_60, %c0_61] : memref<1x1x128xf32, #tpu.memory_space<vmem>>, vector<1x1x128xf32>
    %41 = vector.broadcast %40 : vector<1x1x128xf32> to vector<2x16x128xf32>
    %42 = arith.addf %39, %41 : vector<2x16x128xf32>
    %cst_62 = arith.constant 0.000000e+00 : f32
    %43 = vector.broadcast %cst_62 : f32 to vector<2x16x128xf32>
    %44 = arith.maximumf %42, %43 : vector<2x16x128xf32>
    %c0_63 = arith.constant 0 : index
    %c1_64 = arith.constant 1 : index
    %c0_65 = arith.constant 0 : index
    %45 = vector.load %arg9[%c0_63, %c1_64, %c0_65] : memref<2x18x128xf32, #tpu.memory_space<vmem>>, vector<2x16x128xf32>
    tpu.vector_store %arg9[%c0_63, %c1_64, %c0_65], %44 {strides = array<i32>} : memref<2x18x128xf32, #tpu.memory_space<vmem>>, vector<2x16x128xf32>,
    %c0_66 = arith.constant 0 : index
    %c0_67 = arith.constant 0 : index
    %c0_68 = arith.constant 0 : index
    %46 = vector.load %arg9[%c0_66, %c0_67, %c0_68] : memref<2x18x128xf32, #tpu.memory_space<vmem>>, vector<2x16x128xf32>
    %c0_69 = arith.constant 0 : index
    %c0_70 = arith.constant 0 : index
    %c0_71 = arith.constant 0 : index
    %47 = vector.load %arg3[%c0_69, %c0_70, %c0_71] : memref<3x128x128xf32, #tpu.memory_space<vmem>>, vector<1x128x128xf32>
    %48 = vector.shape_cast %47 : vector<1x128x128xf32> to vector<128x128xf32>
    %cst_72 = arith.constant dense<0.000000e+00> : vector<2x16x128xf32>
    %49 = tpu.matmul %46, %48, %cst_72 {dimension_numbers = #tpu.dot_dimension_numbers<[2], [0], [0, 1], [1], [0, 0, 0, 1, 1, 1], [], []>} : vector<2x16x128xf32>, vector<128x128xf32>, vector<2x16x128xf32> -> vector<2x16x128xf32>
    %c0_73 = arith.constant 0 : index
    %c1_74 = arith.constant 1 : index
    %c0_75 = arith.constant 0 : index
    %50 = vector.load %arg9[%c0_73, %c1_74, %c0_75] : memref<2x18x128xf32, #tpu.memory_space<vmem>>, vector<2x16x128xf32>
    %c1_76 = arith.constant 1 : index
    %c0_77 = arith.constant 0 : index
    %c0_78 = arith.constant 0 : index
    %51 = vector.load %arg3[%c1_76, %c0_77, %c0_78] : memref<3x128x128xf32, #tpu.memory_space<vmem>>, vector<1x128x128xf32>
    %52 = vector.shape_cast %51 : vector<1x128x128xf32> to vector<128x128xf32>
    %cst_79 = arith.constant dense<0.000000e+00> : vector<2x16x128xf32>
    %53 = tpu.matmul %50, %52, %cst_79 {dimension_numbers = #tpu.dot_dimension_numbers<[2], [0], [0, 1], [1], [0, 0, 0, 1, 1, 1], [], []>} : vector<2x16x128xf32>, vector<128x128xf32>, vector<2x16x128xf32> -> vector<2x16x128xf32>
    %54 = arith.addf %49, %53 : vector<2x16x128xf32>
    %c0_80 = arith.constant 0 : index
    %c2_81 = arith.constant 2 : index
    %c0_82 = arith.constant 0 : index
    %55 = vector.load %arg9[%c0_80, %c2_81, %c0_82] : memref<2x18x128xf32, #tpu.memory_space<vmem>>, vector<2x16x128xf32>
    %c2_83 = arith.constant 2 : index
    %c0_84 = arith.constant 0 : index
    %c0_85 = arith.constant 0 : index
    %56 = vector.load %arg3[%c2_83, %c0_84, %c0_85] : memref<3x128x128xf32, #tpu.memory_space<vmem>>, vector<1x128x128xf32>
    %57 = vector.shape_cast %56 : vector<1x128x128xf32> to vector<128x128xf32>
    %cst_86 = arith.constant dense<0.000000e+00> : vector<2x16x128xf32>
    %58 = tpu.matmul %55, %57, %cst_86 {dimension_numbers = #tpu.dot_dimension_numbers<[2], [0], [0, 1], [1], [0, 0, 0, 1, 1, 1], [], []>} : vector<2x16x128xf32>, vector<128x128xf32>, vector<2x16x128xf32> -> vector<2x16x128xf32>
    %59 = arith.addf %54, %58 : vector<2x16x128xf32>
    %c0_87 = arith.constant 0 : index
    %c0_88 = arith.constant 0 : index
    %c0_89 = arith.constant 0 : index
    %60 = vector.load %arg6[%c0_87, %c0_88, %c0_89] : memref<1x1x128xf32, #tpu.memory_space<vmem>>, vector<1x1x128xf32>
    %61 = vector.broadcast %60 : vector<1x1x128xf32> to vector<2x16x128xf32>
    %62 = arith.addf %59, %61 : vector<2x16x128xf32>
    %cst_90 = arith.constant 0.000000e+00 : f32
    %63 = vector.broadcast %cst_90 : f32 to vector<2x16x128xf32>
    %64 = arith.maximumf %62, %63 : vector<2x16x128xf32>
    %c0_91 = arith.constant 0 : index
    %c0_92 = arith.constant 0 : index
    %c0_93 = arith.constant 0 : index
    %65 = vector.load %arg7[%c0_91, %c0_92, %c0_93] : memref<2x16x128xf32, #tpu.memory_space<vmem>>, vector<2x16x128xf32>
    tpu.vector_store %arg7[%c0_91, %c0_92, %c0_93], %64 {strides = array<i32>} : memref<2x16x128xf32, #tpu.memory_space<vmem>>, vector<2x16x128xf32>,
    return
  }
}

</mosaic_0001>

<bundles_post_ra>
// kernel: feat_extract_mid_forward.1
= control target key start
LH: loop header
LB: loop body
LE: loop exit
PB: predicated region body
PF: predicated region fallthrough
CT: control target
= control target key end

     0   :  { %12 = vsyncpa [#allocation5], 0  ;;  %s1009_s0 = inlined_call_operand.vmem [shape: f32[2,16,64], index: 0, kind: input, shape index: {}]   ;;  %s1010_s1 = inlined_call_operand.hbm [shape: f32[3,64,128], index: 1, kind: input, shape index: {}]   ;;  %s1011_s2 = inlined_call_operand.vmem [shape: f32[3,128,128], index: 2, kind: input, shape index: {}]   ;;  %s1012_s3 = inlined_call_operand.hbm [shape: f32[3,128,128], index: 3, kind: input, shape index: {}]   ;;  %s1013_s4 = inlined_call_operand.vmem [shape: f32[1,1,128], index: 4, kind: input, shape index: {}]   ;;  %s1014_s5 = inlined_call_operand.vmem [shape: f32[1,1,128], index: 5, kind: input, shape index: {}]   ;;  %s1015_s6 = inlined_call_operand.vmem [shape: f32[1,1,128], index: 6, kind: input, shape index: {}]   ;;  %s1016_s7 = inlined_call_operand.vmem [shape: f32[2,16,128], index: 7, kind: output, shape index: {}]  }
   0x1   :  { %s20_s26 = sshll.u32 %s1010_s1, 4  ;;  %s21_s26 = int_to_ptr.hbm [resolvable:$true] %s20_s26 }
   0x2   :  { %13 = vsyncpa [#allocation7], 0  ;;  %s741_s27 = smov [#allocation4]   ;;  %s35_s8 = sshll.u32 %s1012_s3, 4  ;;  %s36_s8 = int_to_ptr.hbm [resolvable:$true] %s35_s8 }
   0x3   :  { %s22_s28 = sshll.u32 %s741_s27, 4  ;;  %s742_s9 = smov 128   ;;  %s23_s28 = int_to_ptr.vmem [resolvable:$true] %s22_s28 }
   0x4   :  { %s743_s10 = smov 8   ;;  %s744_s11 = smov [#allocation6]  }
   0x5   :  { %28 = dma.hbm_to_vmem [thread:$0]  %s21_s26, 3072, %s23_s28, [#allocation5], %s742_s9, %s742_s9, %s743_s10  }
   0x6   :  { %s37_s12 = sshll.u32 %s744_s11, 4  ;;  %s38_s12 = int_to_ptr.vmem [resolvable:$true] %s37_s12 }
   0x7   :  { %43 = dma.hbm_to_vmem [thread:$0]  %s36_s8, 6144, %s38_s12, [#allocation7], %s742_s9, %s742_s9, %s743_s10  }
   0x8   :  { %737 = dma.done.wait [#allocation5], 3072  }
   0x9   :  { %738 = vsyncadd [#allocation5], 4294964224 }
   0xa   :  { %739 = dma.done.wait [#allocation7], 6144  }
   0xb   :  { %740 = vsyncadd [#allocation7], 4294961152  ;;  %vm58_vm0 = vcmask 523264   ;;  %vm61_vm1 = vcmask 517120   ;;  %v745_v0 = vmov 0.0   ;;  %v193_v1 = vld [vmem:[#allocation4 + $0xb8] sm:$0xff] }
   0xc   :  { %59 = vst.msk [vmem:[#allocation2] sm:$0xff] %vm58_vm0, %v745_v0  ;;  %v192_v2 = vld [vmem:[#allocation4 + $0xb0] sm:$0xff]  ;;  %v98_v3 = vld [vmem:[#allocation4 + $0x78] sm:$0xff]  ;;  %214 = vmatpush.msra.mxu2 %v193_v1  ;;  %v191_v6 = vld [vmem:[#allocation4 + $0xa8] sm:$0xff] }
   0xd   :  { %60 = vst.msk [vmem:[#allocation2 + $0x8] sm:$0xff] %vm58_vm0, %v745_v0  ;;  %119 = vmatpush.msra.mxu0 %v98_v3  ;;  %v85_v4 = vld [vmem:[#allocation4 + $0x38] sm:$0xff]  ;;  %v97_v5 = vld [vmem:[#allocation4 + $0x70] sm:$0xff]  ;;  %v96_v8 = vld [vmem:[#allocation4 + $0x68] sm:$0xff] }
   0xe   :  { %62 = vst.msk [vmem:[#allocation2 + $0x10] sm:$0x3] %vm61_vm1, %v745_v0  ;;  %160 = vmatpush.msra.mxu1 %v85_v4  ;;  %v84_v7 = vld [vmem:[#allocation4 + $0x30] sm:$0xff]  ;;  %215 = vmatpush.msra.mxu2 %v192_v2  ;;  %v83_v9 = vld [vmem:[#allocation4 + $0x28] sm:$0xff]  ;;  %v190_v10 = vld [vmem:[#allocation4 + $0xa0] sm:$0xff] }
   0xf   :  { %63 = vst.msk [vmem:[#allocation2 + $0x18] sm:$0xff] %vm58_vm0, %v745_v0  ;;  %120 = vmatpush.msra.mxu0 %v97_v5  ;;  %v95_v11 = vld [vmem:[#allocation4 + $0x60] sm:$0xff]  ;;  %v189_v13 = vld [vmem:[#allocation4 + $0x98] sm:$0xff]  ;;  %v67_v17 = vld [vmem:[%s1009_s0 + $0x8] sm:$0xff] }
  0x10   :  { %64 = vst.msk [vmem:[#allocation2 + $0x20] sm:$0xff] %vm58_vm0, %v745_v0  ;;  %161 = vmatpush.msra.mxu1 %v84_v7  ;;  %216 = vmatpush.msra.mxu2 %v191_v6  ;;  %v82_v12 = vld [vmem:[#allocation4 + $0x20] sm:$0xff]  ;;  %v94_v14 = vld [vmem:[#allocation4 + $0x58] sm:$0xff]  ;;  %v188_v18 = vld [vmem:[#allocation4 + $0x90] sm:$0xff] }
  0x11   :  { %65 = vst.msk [vmem:[#allocation2 + $0x28] sm:$0x3] %vm61_vm1, %v745_v0  ;;  %121 = vmatpush.msra.mxu0 %v96_v8  ;;  %v66_v15 = vld [vmem:[%s1009_s0] sm:$0xff]  ;;  %v81_v16 = vld [vmem:[#allocation4 + $0x18] sm:$0xff]  ;;  %v93_v19 = vld [vmem:[#allocation4 + $0x50] sm:$0xff] }
  0x12   :  { %251 = vst [vmem:[#allocation3] sm:$0xff] %v745_v0  ;;  %162 = vmatpush.msra.mxu1 %v83_v9  ;;  %217 = vmatpush.msra.mxu2 %v190_v10  ;;  %v68_v20 = vld [vmem:[%s1009_s0 + $0x10] sm:$0xff]  ;;  %v69_v22 = vld [vmem:[%s1009_s0 + $0x18] sm:$0xff]  ;;  %v187_v24 = vld [vmem:[#allocation4 + $0x88] sm:$0xff] }
  0x13   :  { %252 = vst [vmem:[#allocation3 + $0x8] sm:$0xff] %v745_v0  ;;  %122 = vmatpush.msra.mxu0 %v95_v11  ;;  %v80_v21 = vld [vmem:[#allocation4 + $0x10] sm:$0xff]  ;;  %v632_v23 = vld [vmem:[%s1011_s2 + $0xf8] sm:$0xff]  ;;  %v92_v25 = vld [vmem:[#allocation4 + $0x48] sm:$0xff] }
  0x14   :  { %253 = vst [vmem:[#allocation3 + $0x10] sm:$0x3] %v745_v0  ;;  %163 = vmatpush.msra.mxu1 %v82_v12  ;;  %218 = vmatpush.msra.mxu2 %v189_v13  ;;  %v631_v26 = vld [vmem:[%s1011_s2 + $0xf0] sm:$0xff]  ;;  %v79_v27 = vld [vmem:[#allocation4 + $0x8] sm:$0xff]  ;;  %v186_v29 = vld [vmem:[#allocation4 + $0x80] sm:$0xff] }
  0x15   :  { %254 = vst [vmem:[#allocation3 + $0x18] sm:$0xff] %v745_v0  ;;  %123 = vmatpush.msra.mxu0 %v94_v14  ;;  %302 = vmatpush.msra.mxu3 %v632_v23  ;;  %v630_v28 = vld [vmem:[%s1011_s2 + $0xe8] sm:$0xff]  ;;  %v91_v30 = vld [vmem:[#allocation4 + $0x40] sm:$0xff]  ;;  %v280_v35 = vld [vmem:[%s1011_s2 + $0x78] sm:$0xff] }
  0x16   :  { %255 = vst [vmem:[#allocation3 + $0x20] sm:$0xff] %v745_v0  ;;  %164 = vmatpush.msra.mxu1 %v81_v16  ;;  %219 = vmatpush.msra.mxu2 %v188_v18  ;;  %v78_v31 = vld [vmem:[#allocation4] sm:$0xff]  ;;  %v648_v37 = vld [vmem:[%s1011_s2 + $0x178] sm:$0xff]  ;;  %v279_v38 = vld [vmem:[%s1011_s2 + $0x70] sm:$0xff] }
  0x17   :  { %256 = vst [vmem:[#allocation3 + $0x28] sm:$0x3] %v745_v0  ;;  %124 = vmatpush.msra.mxu0 %v93_v19  ;;  %303 = vmatpush.msra.mxu3 %v631_v26  ;;  %v629_v36 = vld [vmem:[%s1011_s2 + $0xe0] sm:$0xff]  ;;  %v628_v39 = vld [vmem:[%s1011_s2 + $0xd8] sm:$0xff]  ;;  %v278_v40 = vld [vmem:[%s1011_s2 + $0x68] sm:$0xff] }
  0x18   :  { %70 = vst.msk [vmem:[#allocation2 + $0x1] sm:$0xff] %vm58_vm0, %v66_v15  ;;  %165 = vmatpush.msra.mxu1 %v80_v21  ;;  %220 = vmatpush.msra.mxu2 %v187_v24  ;;  %v647_v41 = vld [vmem:[%s1011_s2 + $0x170] sm:$0xff]  ;;  %v646_v43 = vld [vmem:[%s1011_s2 + $0x168] sm:$0xff]  ;;  %v277_v45 = vld [vmem:[%s1011_s2 + $0x60] sm:$0xff] }
  0x19   :  { %71 = vst.msk [vmem:[#allocation2 + $0x9] sm:$0xff] %vm58_vm0, %v67_v17  ;;  %125 = vmatpush.msra.mxu0 %v92_v25  ;;  %304 = vmatpush.msra.mxu3 %v630_v28  ;;  %v627_v42 = vld [vmem:[%s1011_s2 + $0xd0] sm:$0xff]  ;;  %v276_v48 = vld [vmem:[%s1011_s2 + $0x58] sm:$0xff]  ;;  %v626_v49 = vld [vmem:[%s1011_s2 + $0xc8] sm:$0xff] }
  0x1a   :  { %72 = vst.msk [vmem:[#allocation2 + $0x19] sm:$0xff] %vm58_vm0, %v68_v20  ;;  %166 = vmatpush.msra.mxu1 %v79_v27  ;;  %221 = vmatpush.msra.mxu2 %v186_v29  ;;  %v645_v50 = vld [vmem:[%s1011_s2 + $0x160] sm:$0xff]  ;;  %v275_v51 = vld [vmem:[%s1011_s2 + $0x50] sm:$0xff]  ;;  %v274_v52 = vld [vmem:[%s1011_s2 + $0x48] sm:$0xff] }
  0x1b   :  { %73 = vst.msk [vmem:[#allocation2 + $0x21] sm:$0xff] %vm58_vm0, %v69_v22  ;;  %126 = vmatpush.msra.mxu0 %v91_v30  ;;  %305 = vmatpush.msra.mxu3 %v629_v36  ;;  %v625_v59 = vld [vmem:[%s1011_s2 + $0xc0] sm:$0xff]  ;;  %v624_v60 = vld [vmem:[%s1011_s2 + $0xb8] sm:$0xff]  ;;  %v623_v61 = vld [vmem:[%s1011_s2 + $0xb0] sm:$0xff] }
  0x1c   :  { %167 = vmatpush.msra.mxu1 %v78_v31  ;;  %v622_v62 = vld [vmem:[%s1011_s2 + $0xa8] sm:$0xff]  ;;  %v273_v63 = vld [vmem:[%s1011_s2 + $0x40] sm:$0xff]  ;;  %v644_v0 = vld [vmem:[%s1011_s2 + $0x158] sm:$0xff] }
  0x1d   :  { %331 = vmatpush.msrb.mxu0 %v280_v35  ;;  %306 = vmatpush.msra.mxu3 %v628_v39  ;;  %v621_v1 = vld [vmem:[%s1011_s2 + $0xa0] sm:$0xff]  ;;  %v272_v2 = vld [vmem:[%s1011_s2 + $0x38] sm:$0xff]  ;;  %v643_v4 = vld [vmem:[%s1011_s2 + $0x150] sm:$0xff] }
  0x1e   :  { %381 = vmatpush.msrb.mxu1 %v648_v37  ;;  %v620_v3 = vld [vmem:[%s1011_s2 + $0x98] sm:$0xff]  ;;  %v271_v5 = vld [vmem:[%s1011_s2 + $0x30] sm:$0xff]  ;;  %v642_v7 = vld [vmem:[%s1011_s2 + $0x148] sm:$0xff] }
  0x1f   :  { %v86_v32 = vld [vmem:[#allocation2 + $0x1] sm:$0xff]  ;;  %332 = vmatpush.msrb.mxu0 %v279_v38  ;;  %307 = vmatpush.msra.mxu3 %v627_v42  ;;  %v619_v6 = vld [vmem:[%s1011_s2 + $0x90] sm:$0xff]  ;;  %v640_v13 = vld [vmem:[%s1011_s2 + $0x138] sm:$0xff] }
  0x20   :  { %v74_v33 = vld [vmem:[#allocation2] sm:$0xff]  ;;  %605 = vmatmul.msk.f32.vlgmr.msra.gmra.mxu0 %vm58_vm0, %v86_v32  ;;  %v182_v44 = vld [vmem:[#allocation2 + $0xa] sm:$0xff]  ;;  %382 = vmatpush.msrb.mxu1 %v647_v41  ;;  %v268_v14 = vld [vmem:[%s1011_s2 + $0x18] sm:$0xff] }
  0x21   :  { %v181_v34 = vld [vmem:[#allocation2 + $0x2] sm:$0xff]  ;;  %609 = vmatmul.msk.f32.vlgmr.msra.gmra.mxu1 %vm58_vm0, %v74_v33  ;;  %333 = vmatpush.msrb.mxu0 %v278_v40  ;;  %v88_v54 = vld [vmem:[#allocation2 + $0x19] sm:$0xff]  ;;  %v639_v15 = vld [vmem:[%s1011_s2 + $0x130] sm:$0xff] }
  0x22   :  { %613 = vmatmul.msk.f32.vlgmr.msra.gmra.mxu2 %vm58_vm0, %v181_v34  ;;  %v87_v46 = vld [vmem:[#allocation2 + $0x9] sm:$0xff]  ;;  %383 = vmatpush.msrb.mxu1 %v646_v43  ;;  %v183_v53 = vld [vmem:[#allocation2 + $0x1a] sm:$0xff] }
  0x23   :  { %v75_v47 = vld [vmem:[#allocation2 + $0x8] sm:$0xff]  ;;  %334 = vmatpush.msrb.mxu0 %v277_v45  ;;  %308 = vmatpush.msra.mxu3 %v626_v49  ;;  %v76_v55 = vld [vmem:[#allocation2 + $0x18] sm:$0xff]  ;;  %v77_v58 = vld [vmem:[#allocation2 + $0x20] sm:$0xff] }
  0x24   :  { %384 = vmatpush.msrb.mxu1 %v645_v50  ;;  %v184_v56 = vld [vmem:[#allocation2 + $0x22] sm:$0xff]  ;;  %v267_v16 = vld [vmem:[%s1011_s2 + $0x10] sm:$0xff]  ;;  %v636_v21 = vld [vmem:[%s1011_s2 + $0x118] sm:$0xff] }
  0x25   :  { %335 = vmatpush.msrb.mxu0 %v276_v48  ;;  %v89_v57 = vld [vmem:[#allocation2 + $0x21] sm:$0xff]  ;;  %309 = vmatpush.msra.mxu3 %v625_v59  ;;  %v635_v22 = vld [vmem:[%s1011_s2 + $0x110] sm:$0xff]  ;;  %v686_v28 = vld [vmem:[%s1013_s4] ss:$0 sm:$0xff] }
  0x26   :  { %385 = vmatpush.msrb.mxu1 %v644_v0  ;;  %v270_v8 = vld [vmem:[%s1011_s2 + $0x28] sm:$0xff]  ;;  %v641_v10 = vld [vmem:[%s1011_s2 + $0x140] sm:$0xff]  ;;  %v449_v45 = vld [vmem:[#allocation6 + $0x78] sm:$0xff] }
  0x27   :  { %336 = vmatpush.msrb.mxu0 %v275_v51  ;;  %310 = vmatpush.msra.mxu3 %v624_v60  ;;  %v618_v9 = vld [vmem:[%s1011_s2 + $0x88] sm:$0xff]  ;;  %v269_v11 = vld [vmem:[%s1011_s2 + $0x20] sm:$0xff]  ;;  %v448_v48 = vld [vmem:[#allocation6 + $0x70] sm:$0xff] }
  0x28   :  { %606 = vmatmul.msk.f32.gmra.mxu0 %vm58_vm0, %v87_v46  ;;  %386 = vmatpush.msrb.mxu1 %v643_v4  ;;  %v617_v12 = vld [vmem:[%s1011_s2 + $0x80] sm:$0xff]  ;;  %v638_v17 = vld [vmem:[%s1011_s2 + $0x128] sm:$0xff]  ;;  %v469_v46 = vld [vmem:[#allocation6 + $0xf0] sm:$0xff] }
  0x29   :  { %610 = vmatmul.msk.f32.gmra.mxu1 %vm58_vm0, %v75_v47  ;;  %337 = vmatpush.msrb.mxu0 %v274_v52  ;;  %v266_v18 = vld [vmem:[%s1011_s2 + $0x8] sm:$0xff]  ;;  %v637_v19 = vld [vmem:[%s1011_s2 + $0x120] sm:$0xff]  ;;  %v466_v59 = vld [vmem:[#allocation6 + $0xd8] sm:$0xff] }
  0x2a   :  { %614 = vmatmul.msk.f32.gmra.mxu2 %vm58_vm0, %v182_v44  ;;  %311 = vmatpush.msra.mxu3 %v623_v61  ;;  %v265_v20 = vld [vmem:[%s1011_s2] sm:$0xff]  ;;  %v634_v23 = vld [vmem:[%s1011_s2 + $0x108] sm:$0xff]  ;;  %v470_v44 = vld [vmem:[#allocation6 + $0xf8] sm:$0xff] }
  0x2b   :  { %338 = vmatpush.msrb.mxu0 %v273_v63  ;;  %387 = vmatpush.msrb.mxu1 %v642_v7  ;;  %v633_v24 = vld [vmem:[%s1011_s2 + $0x100] sm:$0xff]  ;;  %v468_v50 = vld [vmem:[#allocation6 + $0xe8] sm:$0xff]  ;;  %v465_v7 = vld [vmem:[#allocation6 + $0xd0] sm:$0xff] }
  0x2c   :  { %312 = vmatpush.msra.mxu3 %v622_v62  ;;  %471 = vmatpush.msrb.mxu2 %v470_v44  ;;  %v447_v51 = vld [vmem:[#allocation6 + $0x68] sm:$0xff] }
  0x2d   :  { %339 = vmatpush.msrb.mxu0 %v272_v2  ;;  %388 = vmatpush.msrb.mxu1 %v641_v10  ;;  %v445_v10 = vld [vmem:[#allocation6 + $0x58] sm:$0xff]  ;;  %v535_v44 = vld [vmem:[#allocation6 + $0x108] sm:$0xff] }
  0x2e   :  { %313 = vmatpush.msra.mxu3 %v621_v1  ;;  %472 = vmatpush.msrb.mxu2 %v469_v46 }
  0x2f   :  { %340 = vmatpush.msrb.mxu0 %v271_v5  ;;  %389 = vmatpush.msrb.mxu1 %v640_v13  ;;  %v974_v13 = vld [vmem:[#allocation6 + $0x170] sm:$0xff] }
  0x30   :  { %607 = vmatmul.msk.f32.gmra.mxu0 %vm58_vm0, %v88_v54  ;;  %314 = vmatpush.msra.mxu3 %v620_v3 }
  0x31   :  { %611 = vmatmul.msk.f32.gmra.mxu1 %vm58_vm0, %v76_v55  ;;  %341 = vmatpush.msrb.mxu0 %v270_v8  ;;  %v467_v55 = vld [vmem:[#allocation6 + $0xe0] sm:$0xff]  ;;  %v464_v8 = vld [vmem:[#allocation6 + $0xc8] sm:$0xff] }
  0x32   :  { %615 = vmatmul.msk.f32.gmra.mxu2 %vm58_vm0, %v183_v53  ;;  %315 = vmatpush.msra.mxu3 %v619_v6 }
  0x33   :  { %342 = vmatpush.msrb.mxu0 %v269_v11  ;;  %390 = vmatpush.msrb.mxu1 %v639_v15  ;;  %v971_v11 = vld [vmem:[#allocation6 + $0x178] sm:$0xff]  ;;  %v977_v15 = vld [vmem:[#allocation6 + $0x168] sm:$0xff] }
  0x34   :  { %316 = vmatpush.msra.mxu3 %v618_v9  ;;  %473 = vmatpush.msrb.mxu2 %v468_v50  ;;  %v463_v9 = vld [vmem:[#allocation6 + $0xc0] sm:$0xff] }
  0x35   :  { %343 = vmatpush.msrb.mxu0 %v268_v14  ;;  %391 = vmatpush.msrb.mxu1 %v638_v17  ;;  %v443_v14 = vld [vmem:[#allocation6 + $0x48] sm:$0xff]  ;;  %v461_v17 = vld [vmem:[#allocation6 + $0xb0] sm:$0xff] }
  0x36   :  { %317 = vmatpush.msra.mxu3 %v617_v12  ;;  %474 = vmatpush.msrb.mxu2 %v467_v55  ;;  %v444_v12 = vld [vmem:[#allocation6 + $0x50] sm:$0xff] }
  0x37   :  { %344 = vmatpush.msrb.mxu0 %v267_v16  ;;  %392 = vmatpush.msrb.mxu1 %v637_v19  ;;  %v462_v16 = vld [vmem:[#allocation6 + $0xb8] sm:$0xff]  ;;  %v981_v19 = vld [vmem:[#allocation6 + $0x160] sm:$0xff] }
  0x38   :  { %608 = vmatmul.msk.f32.gmra.mxu0 %vm58_vm0, %v89_v57  ;;  %500 = vmatpush.msrb.mxu3 %v449_v45  ;;  %v534_v45 = vld [vmem:[#allocation6 + $0x100] sm:$0xff] }
  0x39   :  { %612 = vmatmul.msk.f32.gmra.mxu1 %vm58_vm0, %v77_v58  ;;  %345 = vmatpush.msrb.mxu0 %v266_v18  ;;  %v442_v18 = vld [vmem:[#allocation6 + $0x40] sm:$0xff] }
  0x3a   :  { %616 = vmatmul.msk.f32.gmra.mxu2 %vm58_vm0, %v184_v56  ;;  %393 = vmatpush.msrb.mxu1 %v636_v21  ;;  %v446_v56 = vld [vmem:[#allocation6 + $0x60] sm:$0xff] }
  0x3b   :  { %346 = vmatpush.msrb.mxu0 %v265_v20  ;;  %501 = vmatpush.msrb.mxu3 %v448_v48  ;;  %v460_v20 = vld [vmem:[#allocation6 + $0xa8] sm:$0xff]  ;;  %v459_v21 = vld [vmem:[#allocation6 + $0xa0] sm:$0xff] }
  0x3c   :  { %394 = vmatpush.msrb.mxu1 %v635_v22  ;;  %475 = vmatpush.msrb.mxu2 %v466_v59  ;;  %v441_v22 = vld [vmem:[#allocation6 + $0x38] sm:$0xff] }
  0x3d   :  { %502 = vmatpush.msrb.mxu3 %v447_v51  ;;  %550 = vmatpush.msra.mxu0 %v971_v11 }
  0x3e   :  { %395 = vmatpush.msrb.mxu1 %v634_v23  ;;  %476 = vmatpush.msrb.mxu2 %v465_v7  ;;  %v545_v23 = vld [vmem:[#allocation6 + $0x158] sm:$0xff] }
  0x3f   :  { %503 = vmatpush.msrb.mxu3 %v446_v56  ;;  %551 = vmatpush.msra.mxu0 %v974_v13 }
  0x40   :  { %396 = vmatpush.msrb.mxu1 %v633_v24  ;;  %477 = vmatpush.msrb.mxu2 %v464_v8  ;;  %v458_v24 = vld [vmem:[#allocation6 + $0x98] sm:$0xff] }
  0x41   :  { %504 = vmatpush.msrb.mxu3 %v445_v10  ;;  %552 = vmatpush.msra.mxu0 %v977_v15 }
  0x42   :  { %478 = vmatpush.msrb.mxu2 %v463_v9  ;;  %649 = vmatpush.msra.mxu1 %v971_v11 }
  0x43   :  { %505 = vmatpush.msrb.mxu3 %v444_v12  ;;  %553 = vmatpush.msra.mxu0 %v981_v19 }
  0x44   :  { %651 = vmatpush.msra.mxu1 %v974_v13  ;;  %479 = vmatpush.msrb.mxu2 %v462_v16 }
  0x45   :  { %506 = vmatpush.msrb.mxu3 %v443_v14  ;;  %554 = vmatpush.msra.mxu0 %v545_v23 }
  0x46   :  { %653 = vmatpush.msra.mxu1 %v977_v15  ;;  %480 = vmatpush.msrb.mxu2 %v461_v17 }
  0x47   :  { %507 = vmatpush.msrb.mxu3 %v442_v18 }
  0x48   :  { %655 = vmatpush.msra.mxu1 %v981_v19  ;;  %481 = vmatpush.msrb.mxu2 %v460_v20 }
  0x49   :  { %508 = vmatpush.msrb.mxu3 %v441_v22 }
  0x4a   :  { %657 = vmatpush.msra.mxu1 %v545_v23  ;;  %482 = vmatpush.msrb.mxu2 %v459_v21 }
  0x4c   :  { %483 = vmatpush.msrb.mxu2 %v458_v24 }
  0x9d   :  { %v128_v25 = vpop.f32.mrf.mxu0 }
  0x9e   :  { %v169_v26 = vpop.f32.mrf.mxu1 }
  0x9f   :  { %v170_v27 = vadd.f32 %v169_v26, %v128_v25  ;;  %v440_v25 = vld [vmem:[#allocation6 + $0x30] sm:$0xff] }
  0xa0   :  { %v544_v26 = vld [vmem:[#allocation6 + $0x150] sm:$0xff]  ;;  %509 = vmatpush.msrb.mxu3 %v440_v25 }
  0xa1   :  { %555 = vmatpush.msra.mxu0 %v544_v26  ;;  %659 = vmatpush.msra.mxu1 %v544_v26 }
  0xa5   :  { %v223_v29 = vpop.f32.mrf.mxu2  ;;  %v131_v32 = vpop.f32.mrf.mxu0 }
  0xa6   :  { %v235_v30 = vadd.f32 %v223_v29, %v170_v27  ;;  %v172_v33 = vpop.f32.mrf.mxu1  ;;  %v457_v27 = vld [vmem:[#allocation6 + $0x90] sm:$0xff]  ;;  %v543_v29 = vld [vmem:[#allocation6 + $0x148] sm:$0xff] }
  0xa7   :  { %v173_v35 = vadd.f32 %v172_v33, %v131_v32  ;;  %556 = vmatpush.msra.mxu0 %v543_v29  ;;  %661 = vmatpush.msra.mxu1 %v543_v29  ;;  %v542_v32 = vld [vmem:[#allocation6 + $0x140] sm:$0xff] }
  0xa8   :  { %v243_v31 = vadd.f32 %v686_v28, %v235_v30  ;;  %v456_v30 = vld [vmem:[#allocation6 + $0x88] sm:$0xff]  ;;  %484 = vmatpush.msrb.mxu2 %v457_v27  ;;  %v455_v33 = vld [vmem:[#allocation6 + $0x80] sm:$0xff] }
  0xa9   :  { %557 = vmatpush.msra.mxu0 %v542_v32  ;;  %663 = vmatpush.msra.mxu1 %v542_v32 }
  0xaa   :  { %v247_v34 = vmax.f32 %v243_v31, 0.0  ;;  %v438_v31 = vld [vmem:[#allocation6 + $0x20] sm:$0xff]  ;;  %485 = vmatpush.msrb.mxu2 %v456_v30 }
  0xac   :  { %257 = vst [vmem:[#allocation3 + $0x1] sm:$0xff] %v247_v34  ;;  %318 = vmatmul.f32.vlgmr.msra.gmra.mxu3 %v247_v34  ;;  %v437_v34 = vld [vmem:[#allocation6 + $0x18] sm:$0xff]  ;;  %486 = vmatpush.msrb.mxu2 %v455_v33 }
  0xad   :  { %v226_v36 = vpop.f32.mrf.mxu2  ;;  %v134_v39 = vpop.f32.mrf.mxu0 }
  0xae   :  { %v236_v37 = vadd.f32 %v226_v36, %v173_v35  ;;  %v175_v40 = vpop.f32.mrf.mxu1  ;;  %v541_v35 = vld [vmem:[#allocation6 + $0x138] sm:$0xff]  ;;  %v436_v36 = vld [vmem:[#allocation6 + $0x10] sm:$0xff]  ;;  %650 = vmatpush.msra.mxu2 %v971_v11 }
  0xaf   :  { %v176_v42 = vadd.f32 %v175_v40, %v134_v39  ;;  %558 = vmatpush.msra.mxu0 %v541_v35  ;;  %665 = vmatpush.msra.mxu1 %v541_v35  ;;  %v539_v39 = vld [vmem:[#allocation6 + $0x128] sm:$0xff]  ;;  %v434_v40 = vld [vmem:[#allocation6] sm:$0xff] }
  0xb0   :  { %v244_v38 = vadd.f32 %v686_v28, %v236_v37  ;;  %v540_v37 = vld [vmem:[#allocation6 + $0x130] sm:$0xff]  ;;  %652 = vmatpush.msra.mxu2 %v974_v13 }
  0xb1   :  { %559 = vmatpush.msra.mxu0 %v540_v37  ;;  %667 = vmatpush.msra.mxu1 %v540_v37 }
  0xb2   :  { %v248_v41 = vmax.f32 %v244_v38, 0.0  ;;  %v435_v38 = vld [vmem:[#allocation6 + $0x8] sm:$0xff]  ;;  %654 = vmatpush.msra.mxu2 %v977_v15 }
  0xb3   :  { %v261_v43 = vld [vmem:[#allocation3] sm:$0xff]  ;;  %560 = vmatpush.msra.mxu0 %v539_v39  ;;  %669 = vmatpush.msra.mxu1 %v539_v39 }
  0xb4   :  { %258 = vst [vmem:[#allocation3 + $0x9] sm:$0xff] %v248_v41  ;;  %347 = vmatmul.f32.vlgmr.msrb.gmra.mxu0 %v261_v43  ;;  %321 = vmatmul.f32.gmra.mxu3 %v248_v41  ;;  %v538_v41 = vld [vmem:[#allocation6 + $0x120] sm:$0xff]  ;;  %v536_v43 = vld [vmem:[#allocation6 + $0x110] sm:$0xff] }
  0xb5   :  { %v229_v47 = vpop.f32.mrf.mxu2  ;;  %v137_v53 = vpop.f32.mrf.mxu0  ;;  %561 = vmatpush.msra.mxu0 %v538_v41  ;;  %671 = vmatpush.msra.mxu1 %v538_v41 }
  0xb6   :  { %v237_v49 = vadd.f32 %v229_v47, %v176_v42  ;;  %v178_v54 = vpop.f32.mrf.mxu1  ;;  %v537_v42 = vld [vmem:[#allocation6 + $0x118] sm:$0xff]  ;;  %656 = vmatpush.msra.mxu2 %v981_v19 }
  0xb7   :  { %v179_v58 = vadd.f32 %v178_v54, %v137_v53  ;;  %562 = vmatpush.msra.mxu0 %v537_v42  ;;  %673 = vmatpush.msra.mxu1 %v537_v42 }
  0xb8   :  { %v245_v52 = vadd.f32 %v686_v28, %v237_v49  ;;  %658 = vmatpush.msra.mxu2 %v545_v23  ;;  %v687_v49 = vld [vmem:[%s1014_s5] ss:$0 sm:$0xff] }
  0xb9   :  { %563 = vmatpush.msra.mxu0 %v536_v43  ;;  %675 = vmatpush.msra.mxu1 %v536_v43  ;;  %v688_v23 = vld [vmem:[%s1015_s6] ss:$0 sm:$0xff] }
  0xba   :  { %v249_v57 = vmax.f32 %v245_v52, 0.0  ;;  %660 = vmatpush.msra.mxu2 %v544_v26 }
  0xbb   :  { %v262_v60 = vld [vmem:[#allocation3 + $0x8] sm:$0xff]  ;;  %564 = vmatpush.msra.mxu0 %v535_v44  ;;  %677 = vmatpush.msra.mxu1 %v535_v44 }
  0xbc   :  { %v360_v61 = vld [vmem:[#allocation3 + $0x2] sm:$0xff]  ;;  %259 = vst [vmem:[#allocation3 + $0x19] sm:$0xff] %v249_v57  ;;  %350 = vmatmul.f32.gmra.mxu0 %v262_v60  ;;  %324 = vmatmul.f32.gmra.mxu3 %v249_v57  ;;  %v361_v3 = vld [vmem:[#allocation3 + $0xa] sm:$0xff] }
  0xbd   :  { %397 = vmatmul.f32.vlgmr.msrb.gmra.mxu1 %v360_v61  ;;  %v232_v62 = vpop.f32.mrf.mxu2  ;;  %565 = vmatpush.msra.mxu0 %v534_v45 }
  0xbe   :  { %v238_v63 = vadd.f32 %v232_v62, %v179_v58  ;;  %679 = vmatpush.msra.mxu1 %v534_v45  ;;  %662 = vmatpush.msra.mxu2 %v543_v29 }
  0xc0   :  { %v246_v0 = vadd.f32 %v686_v28, %v238_v63  ;;  %v439_v28 = vld [vmem:[#allocation6 + $0x28] sm:$0xff]  ;;  %664 = vmatpush.msra.mxu2 %v542_v32 }
  0xc1   :  { %510 = vmatpush.msrb.mxu3 %v439_v28 }
  0xc2   :  { %v250_v1 = vmax.f32 %v246_v0, 0.0  ;;  %666 = vmatpush.msra.mxu2 %v541_v35 }
  0xc3   :  { %v263_v2 = vld [vmem:[#allocation3 + $0x18] sm:$0xff]  ;;  %511 = vmatpush.msrb.mxu3 %v438_v31 }
  0xc4   :  { %260 = vst [vmem:[#allocation3 + $0x21] sm:$0xff] %v250_v1  ;;  %353 = vmatmul.f32.gmra.mxu0 %v263_v2  ;;  %327 = vmatmul.f32.gmra.mxu3 %v250_v1 }
  0xc5   :  { %400 = vmatmul.f32.gmra.mxu1 %v361_v3  ;;  %512 = vmatpush.msrb.mxu3 %v437_v34 }
  0xc6   :  { %668 = vmatpush.msra.mxu2 %v540_v37 }
  0xc7   :  { %513 = vmatpush.msrb.mxu3 %v436_v36 }
  0xc8   :  { %670 = vmatpush.msra.mxu2 %v539_v39 }
  0xc9   :  { %514 = vmatpush.msrb.mxu3 %v435_v38 }
  0xca   :  { %672 = vmatpush.msra.mxu2 %v538_v41 }
  0xcb   :  { %v264_v4 = vld [vmem:[#allocation3 + $0x20] sm:$0xff]  ;;  %515 = vmatpush.msrb.mxu3 %v434_v40 }
  0xcc   :  { %v362_v5 = vld [vmem:[#allocation3 + $0x1a] sm:$0xff]  ;;  %356 = vmatmul.f32.gmra.mxu0 %v264_v4  ;;  %v363_v6 = vld [vmem:[#allocation3 + $0x22] sm:$0xff]  ;;  %674 = vmatpush.msra.mxu2 %v537_v42 }
  0xcd   :  { %403 = vmatmul.f32.gmra.mxu1 %v362_v5 }
  0xce   :  { %676 = vmatpush.msra.mxu2 %v536_v43 }
  0xd0   :  { %678 = vmatpush.msra.mxu2 %v535_v44 }
  0xd2   :  { %680 = vmatpush.msra.mxu2 %v534_v45 }
  0xd5   :  { %406 = vmatmul.f32.gmra.mxu1 %v363_v6 }
 0x12f   :  { %v319_v47 = vpop.f32.mrf.mxu3 }
 0x131   :  { %v348_v46 = vpop.f32.mrf.mxu0 }
 0x132   :  { %v349_v48 = vadd.f32 %v348_v46, %v319_v47 }
 0x137   :  { %v322_v53 = vpop.f32.mrf.mxu3 }
 0x139   :  { %v351_v50 = vpop.f32.mrf.mxu0 }
 0x13a   :  { %v398_v51 = vpop.f32.mrf.mxu1  ;;  %v352_v56 = vadd.f32 %v351_v50, %v322_v53 }
 0x13b   :  { %v410_v52 = vadd.f32 %v398_v51, %v349_v48 }
 0x13d   :  { %v418_v54 = vadd.f32 %v687_v49, %v410_v52 }
 0x13f   :  { %v422_v55 = vmax.f32 %v418_v54, 0.0  ;;  %v325_v61 = vpop.f32.mrf.mxu3 }
 0x141   :  { %426 = vst [vmem:[#allocation3 + $0x1] sm:$0xff] %v422_v55  ;;  %487 = vmatmul.f32.vlgmr.msrb.gmra.mxu2 %v422_v55  ;;  %v354_v59 = vpop.f32.mrf.mxu0 }
 0x142   :  { %v401_v57 = vpop.f32.mrf.mxu1  ;;  %v355_v0 = vadd.f32 %v354_v59, %v325_v61 }
 0x143   :  { %v411_v58 = vadd.f32 %v401_v57, %v352_v56 }
 0x145   :  { %v419_v60 = vadd.f32 %v687_v49, %v411_v58 }
 0x147   :  { %v423_v62 = vmax.f32 %v419_v60, 0.0  ;;  %v328_v6 = vpop.f32.mrf.mxu3 }
 0x148   :  { %v430_v63 = vld [vmem:[#allocation3] sm:$0xff] }
 0x149   :  { %427 = vst [vmem:[#allocation3 + $0x9] sm:$0xff] %v423_v62  ;;  %516 = vmatmul.f32.vlgmr.msrb.gmra.mxu3 %v430_v63  ;;  %490 = vmatmul.f32.gmra.mxu2 %v423_v62  ;;  %v357_v4 = vpop.f32.mrf.mxu0 }
 0x14a   :  { %v404_v1 = vpop.f32.mrf.mxu1  ;;  %v358_v10 = vadd.f32 %v357_v4, %v328_v6 }
 0x14b   :  { %v412_v2 = vadd.f32 %v404_v1, %v355_v0 }
 0x14d   :  { %v420_v3 = vadd.f32 %v687_v49, %v412_v2 }
 0x14f   :  { %v424_v5 = vmax.f32 %v420_v3, 0.0 }
 0x150   :  { %v431_v7 = vld [vmem:[#allocation3 + $0x8] sm:$0xff] }
 0x151   :  { %v529_v8 = vld [vmem:[#allocation3 + $0x2] sm:$0xff]  ;;  %v530_v9 = vld [vmem:[#allocation3 + $0xa] sm:$0xff]  ;;  %428 = vst [vmem:[#allocation3 + $0x19] sm:$0xff] %v424_v5  ;;  %519 = vmatmul.f32.gmra.mxu3 %v431_v7  ;;  %493 = vmatmul.f32.gmra.mxu2 %v424_v5 }
 0x152   :  { %566 = vmatmul.f32.vlgmr.msra.gmra.mxu0 %v529_v8  ;;  %569 = vmatmul.f32.vlgmr.msra.gmra.mxu1 %v530_v9  ;;  %v407_v11 = vpop.f32.mrf.mxu1 }
 0x153   :  { %v413_v12 = vadd.f32 %v407_v11, %v358_v10 }
 0x155   :  { %v421_v13 = vadd.f32 %v687_v49, %v413_v12 }
 0x157   :  { %v425_v14 = vmax.f32 %v421_v13, 0.0 }
 0x158   :  { %v432_v15 = vld [vmem:[#allocation3 + $0x18] sm:$0xff] }
 0x159   :  { %429 = vst [vmem:[#allocation3 + $0x21] sm:$0xff] %v425_v14  ;;  %522 = vmatmul.f32.gmra.mxu3 %v432_v15  ;;  %496 = vmatmul.f32.gmra.mxu2 %v425_v14 }
 0x160   :  { %v433_v16 = vld [vmem:[#allocation3 + $0x20] sm:$0xff] }
 0x161   :  { %v531_v17 = vld [vmem:[#allocation3 + $0x1a] sm:$0xff]  ;;  %v532_v18 = vld [vmem:[#allocation3 + $0x22] sm:$0xff]  ;;  %525 = vmatmul.f32.gmra.mxu3 %v433_v16 }
 0x162   :  { %572 = vmatmul.f32.gmra.mxu1 %v531_v17  ;;  %575 = vmatmul.f32.vlgmr.msra.gmra.mxu2 %v532_v18 }
 0x1c4   :  { %v488_v19 = vpop.f32.mrf.mxu2 }
 0x1cc   :  { %v517_v20 = vpop.f32.mrf.mxu3  ;;  %v491_v21 = vpop.f32.mrf.mxu2 }
 0x1cd   :  { %v518_v22 = vadd.f32 %v517_v20, %v488_v19 }
 0x1cf   :  { %v567_v24 = vpop.f32.mrf.mxu0  ;;  %v570_v31 = vpop.f32.mrf.mxu1 }
 0x1d0   :  { %v579_v25 = vadd.f32 %v567_v24, %v518_v22 }
 0x1d2   :  { %v587_v26 = vadd.f32 %v688_v23, %v579_v25 }
 0x1d4   :  { %v591_v27 = vmax.f32 %v587_v26, 0.0  ;;  %v520_v28 = vpop.f32.mrf.mxu3  ;;  %v494_v30 = vpop.f32.mrf.mxu2 }
 0x1d5   :  { %v521_v29 = vadd.f32 %v520_v28, %v491_v21 }
 0x1d6   :  { %595 = vst [vmem:[%s1016_s7] sm:$0xff] %v591_v27 }
 0x1d7   :  { %v580_v32 = vadd.f32 %v570_v31, %v521_v29 }
 0x1d9   :  { %v588_v33 = vadd.f32 %v688_v23, %v580_v32 }
 0x1db   :  { %v592_v34 = vmax.f32 %v588_v33, 0.0 }
 0x1dc   :  { %v523_v35 = vpop.f32.mrf.mxu3  ;;  %v497_v37 = vpop.f32.mrf.mxu2 }
 0x1dd   :  { %596 = vst [vmem:[%s1016_s7 + $0x8] sm:$0xff] %v592_v34  ;;  %v524_v36 = vadd.f32 %v523_v35, %v494_v30 }
 0x1df   :  { %v573_v38 = vpop.f32.mrf.mxu1 }
 0x1e0   :  { %v581_v39 = vadd.f32 %v573_v38, %v524_v36 }
 0x1e2   :  { %v589_v40 = vadd.f32 %v688_v23, %v581_v39 }
 0x1e4   :  { %v593_v41 = vmax.f32 %v589_v40, 0.0  ;;  %v526_v42 = vpop.f32.mrf.mxu3 }
 0x1e5   :  { %v527_v43 = vadd.f32 %v526_v42, %v497_v37  ;;  %v576_v44 = vpop.f32.mrf.mxu2 }
 0x1e6   :  { %597 = vst [vmem:[%s1016_s7 + $0x10] sm:$0xff] %v593_v41 }
 0x1e7   :  { %v582_v45 = vadd.f32 %v576_v44, %v527_v43 }
 0x1e9   :  { %v590_v46 = vadd.f32 %v688_v23, %v582_v45 }
 0x1eb   :  { %v594_v47 = vmax.f32 %v590_v46, 0.0 }
 0x1ed   :  { %598 = vst [vmem:[%s1016_s7 + $0x18] sm:$0xff] %v594_v47 }
 0x1ee   :  { %603 = vsyncpa [#allocation5], 1 }
 0x1ef   :  { %604 = vsyncpa [#allocation7], 1 }

</bundles_post_ra>
